<compile_context>
chip_gen: v7x
topology: tpu7x:2x2x1
jax: 0.10.0
libtpu: 0.0.40
codegen_flags: <defaults>
</compile_context>

<pallas_src>
import functools

import jax
import jax.numpy as jnp
from jax.experimental import pallas as pl
from jax.experimental.pallas import tpu as pltpu

NEG_SLOPE = 0.2
BN_EPS = 1e-5
LANE_PAD = 128  # lane-dense width for projection / prediction outputs

VMEM_SPEC = pl.BlockSpec(memory_space=pltpu.MemorySpace.VMEM)


def _mxu(a, b):
    """MXU matmul: activation cast to bf16 at point of use, weights are
    pre-cast to bf16 host-side, f32 accumulation."""
    return jnp.dot(a.astype(jnp.bfloat16), b, preferred_element_type=jnp.float32)


# --------------------------------------------------------------------------
# Kernel 0: node encoder + relu + first layer's fused projection
# --------------------------------------------------------------------------
def _encode_proj_kernel(feat_ref, ew_ref, eb_ref, pw_ref, pb_ref, o_ref):
    # TODO(synk): at large N tile this row-parallel matmul with a node grid.
    h = jnp.maximum(_mxu(feat_ref[...], ew_ref[...]) + eb_ref[...], 0.0)
    o_ref[...] = _mxu(h, pw_ref[...]) + pb_ref[...]          # (N, LANE_PAD)


# --------------------------------------------------------------------------
# Kernel B: one GATConv layer, tiled over dst-node blocks (parallel grid)
#   proj layout (padded to LANE_PAD cols): [src_fc | dst_fc | attn_src | attn_dst | 0...]
# --------------------------------------------------------------------------
def _gatconv_kernel(ef_ref, adjb_ref, projs_ref, projd_ref, hlast_ref,
                    we_ref, be_ref, waet_ref, out_ref, *,
                    blk, n_src, n_heads, n_hidden):
    H, D = n_heads, n_hidden
    HD = H * D
    Ns = n_src
    e_emb = we_ref.shape[1]

    # -- edge encoder: one small dense matmul (no kron), relu.
    emb = jnp.maximum(_mxu(ef_ref[...], we_ref[...]) + be_ref[...], 0.0)   # (blk*Ns, Eemb)
    emb3 = emb.reshape(blk, Ns, e_emb)      # dst-major split; Ns % 8 == 0 -> layout preserving

    # additive mask-bias (0 for edge, -1e30 for non-edge), built wrapper-side
    adj_bias = adjb_ref[...].astype(jnp.float32)              # (blk, Ns)

    proj_src = projs_ref[...]                                  # (Ns, PPAD) resident across blocks
    proj_dst = projd_ref[...]                                  # (blk, PPAD) this dst block
    feat_src = proj_src[:, :HD].astype(jnp.bfloat16)           # (Ns, HD)  MXU operand
    feat_dst = proj_dst[:, HD:2 * HD]                          # (blk, HD)
    attn_src_t = jnp.transpose(proj_src[:, 2 * HD:2 * HD + H])  # (H, Ns)
    attn_dst = proj_dst[:, 2 * HD + H:2 * HD + 2 * H]          # (blk, H)

    # dst_fc residual branch + outer layer residual (zeros for layer 0)
    base = feat_dst + hlast_ref[...]                           # (blk, HD)

    for h in range(H):
        # per-edge attn_edge logit for head h, directly in (dst, src) layout
        w_h = waet_ref[h, :]                                               # (Eemb,)
        ae = jnp.sum(emb3 * w_h[None, None, :], axis=-1)                   # (blk, Ns)
        e = ae + attn_dst[:, h:h + 1] + attn_src_t[h:h + 1, :]
        e = jnp.where(e > 0, e, NEG_SLOPE * e) + adj_bias                  # leaky-relu, mask folded additively
        m = jnp.max(e, axis=-1, keepdims=True)
        # masked entries underflow to exactly 0; relies on >=1 in-edge per dst
        # (self-loops guaranteed by the wrapper), so no re-mask and denom >= 1.
        p = jnp.exp(e - m)
        a = p * pl.reciprocal(jnp.sum(p, axis=-1, keepdims=True), approx=True)
        agg = jnp.dot(a.astype(jnp.bfloat16), feat_src[:, h * D:(h + 1) * D],
                      preferred_element_type=jnp.float32)                  # (blk, D)
        # write each head straight into its slab of the output (no concat/stack)
        out_ref[:, h * D:(h + 1) * D] = agg + base[:, h * D:(h + 1) * D]


# --------------------------------------------------------------------------
# Kernel C: eval BatchNorm (running stats + affine) + relu + next projection
# --------------------------------------------------------------------------
def _bn_proj_kernel(x_ref, g_ref, b_ref, rm_ref, rv_ref, w_ref, bias_ref, o_ref):
    # TODO(synk): training-mode BN (batch statistics) would need a cross-block
    #             sum/sumsq accumulation pass; eval BN is elementwise and tiles.
    x = x_ref[...]
    hn = (x - rm_ref[...]) * jax.lax.rsqrt(rv_ref[...] + BN_EPS) * g_ref[...] + b_ref[...]
    h = jnp.maximum(hn, 0.0)
    o_ref[...] = _mxu(h, w_ref[...]) + bias_ref[...]           # (N, LANE_PAD)


# --------------------------------------------------------------------------
# Parameters (deterministic, synthetic), pre-packed for the kernels
# --------------------------------------------------------------------------
def xavier_normal(key, fan_in, fan_out, gain=1.0):
    std = gain * (2.0 / (fan_in + fan_out)) ** 0.5
    return std * jax.random.normal(key, (fan_in, fan_out), dtype=jnp.float32)


def _pad_cols(w, width):
    return jnp.pad(w, ((0, 0), (0, width - w.shape[1])))


def make_params(key, node_feats, edge_feats, edge_emb, n_hidden, n_heads,
                n_layers, n_classes):
    gain = 2.0 ** 0.5  # relu gain (GATConv.reset_parameters)
    HD = n_heads * n_hidden
    P = 2 * HD + 2 * n_heads
    assert P <= LANE_PAD and n_classes <= LANE_PAD
    keys = iter(jax.random.split(key, 4 + 8 * n_layers))

    params = dict(n_heads=n_heads, n_hidden=n_hidden, n_layers=n_layers,
                  n_classes=n_classes, proj_pad=LANE_PAD)
    params['node_enc_w'] = xavier_normal(next(keys), node_feats, n_hidden).astype(jnp.bfloat16)
    params['node_enc_b'] = jnp.zeros((1, n_hidden), jnp.float32)

    layers = []
    for i in range(n_layers):
        in_hidden = HD if i > 0 else n_hidden
        w_src = xavier_normal(next(keys), in_hidden, HD, gain)
        w_dst = xavier_normal(next(keys), in_hidden, HD, gain)
        b_dst = jnp.zeros((1, HD), jnp.float32)
        w_asrc = xavier_normal(next(keys), in_hidden, n_heads, gain)
        w_adst = xavier_normal(next(keys), in_hidden, n_heads, gain)
        proj_w = jnp.concatenate([w_src, w_dst, w_asrc, w_adst], axis=1)      # (in, P)
        proj_b = jnp.concatenate([jnp.zeros((1, HD), jnp.float32), b_dst,
                                  jnp.zeros((1, 2 * n_heads), jnp.float32)], axis=1)
        layers.append(dict(
            proj_w=_pad_cols(proj_w, LANE_PAD).astype(jnp.bfloat16),          # lane-dense
            proj_b=_pad_cols(proj_b, LANE_PAD),
            edge_w=xavier_normal(next(keys), edge_feats, edge_emb).astype(jnp.bfloat16),
            edge_b=jnp.zeros((1, edge_emb), jnp.float32),
            # per-head attn_edge weights, pre-transposed to (H, Eemb)
            attn_edge_w_t=jnp.transpose(
                xavier_normal(next(keys), edge_emb, n_heads, gain)),
            # eval BatchNorm params (PyTorch defaults)
            bn_gamma=jnp.ones((1, HD), jnp.float32),
            bn_beta=jnp.zeros((1, HD), jnp.float32),
            bn_mean=jnp.zeros((1, HD), jnp.float32),
            bn_var=jnp.ones((1, HD), jnp.float32),
        ))
    params['layers'] = layers
    params['pred_w'] = _pad_cols(xavier_normal(next(keys), HD, n_classes),
                                 LANE_PAD).astype(jnp.bfloat16)
    params['pred_b'] = _pad_cols(jnp.zeros((1, n_classes), jnp.float32), LANE_PAD)
    return params


# --------------------------------------------------------------------------
# Forward
# --------------------------------------------------------------------------
def gat_forward(params, node_feat, edge_feat, adj, *, dst_block=16):
    """node_feat: (N, node_feats); edge_feat: (N_dst, N_src, E) dense edge
    features (only pairs with adj[src, dst] == 1 participate);
    adj: (N_src, N_dst) 0/1 mask.  dst_block: dst rows per grid step
    (use ~128-256 on v7x, 256-512 on v5e/v6e for real problem sizes)."""
    n = node_feat.shape[0]
    H, D, L = params['n_heads'], params['n_hidden'], params['n_layers']
    HD = H * D
    ppad = params['proj_pad']
    assert n % dst_block == 0 and (dst_block * n) % 16 == 0 and dst_block % 16 == 0
    n_blocks = n // dst_block

    # wrapper-side layout plumbing (free): transpose adj to (dst, src), fold the
    # edge mask into an additive bias, flatten edge feats dst-major, cast bf16.
    adj_bias = jnp.where(jnp.transpose(adj) > 0, 0.0, -1e30).astype(jnp.bfloat16)  # (Nd, Ns)
    ef_flat = edge_feat.reshape(n * n, -1).astype(jnp.bfloat16)                     # (Nd*Ns, E)

    # node encoder + relu (+ input_drop identity) + layer-0 fused projection
    proj = pl.pallas_call(
        _encode_proj_kernel,
        out_shape=jax.ShapeDtypeStruct((n, ppad), jnp.float32),
        in_specs=[VMEM_SPEC] * 5,
        out_specs=VMEM_SPEC,
    )(node_feat, params['node_enc_w'], params['node_enc_b'],
      params['layers'][0]['proj_w'], params['layers'][0]['proj_b'])

    h_last = jnp.zeros((n, HD), jnp.float32)
    out = None
    for i, lp in enumerate(params['layers']):
        gat_kernel = functools.partial(_gatconv_kernel, blk=dst_block, n_src=n,
                                       n_heads=H, n_hidden=D)
        rst = pl.pallas_call(
            gat_kernel,
            out_shape=jax.ShapeDtypeStruct((n, HD), jnp.float32),
            grid=(n_blocks,),
            in_specs=[
                # TODO(synk): on v5e consider pipeline_mode=pl.Buffered(3) here.
                pl.BlockSpec((dst_block * n, ef_flat.shape[1]), lambda b: (b, 0)),  # edge feats
                pl.BlockSpec((dst_block, n), lambda b: (b, 0)),                     # mask bias
                pl.BlockSpec((n, ppad), lambda b: (0, 0)),                          # proj (src, resident)
                pl.BlockSpec((dst_block, ppad), lambda b: (b, 0)),                  # proj (dst block)
                pl.BlockSpec((dst_block, HD), lambda b: (b, 0)),                    # h_last block
                pl.BlockSpec(lp['edge_w'].shape, lambda b: (0, 0)),
                pl.BlockSpec(lp['edge_b'].shape, lambda b: (0, 0)),
                pl.BlockSpec(lp['attn_edge_w_t'].shape, lambda b: (0, 0)),
            ],
            out_specs=pl.BlockSpec((dst_block, HD), lambda b: (b, 0)),
            compiler_params=pltpu.CompilerParams(
                dimension_semantics=("parallel",)),
        )(ef_flat, adj_bias, proj, proj, h_last,
          lp['edge_w'], lp['edge_b'], lp['attn_edge_w_t'])

        if i + 1 < L:
            next_w, next_b = params['layers'][i + 1]['proj_w'], params['layers'][i + 1]['proj_b']
        else:
            next_w, next_b = params['pred_w'], params['pred_b']
        # eval BN + relu (+ dropout identity) fused with the next projection /
        # prediction head; output kept lane-dense (LANE_PAD cols).
        out = pl.pallas_call(
            _bn_proj_kernel,
            out_shape=jax.ShapeDtypeStruct((n, next_w.shape[1]), jnp.float32),
            in_specs=[VMEM_SPEC] * 7,
            out_specs=VMEM_SPEC,
        )(rst, lp['bn_gamma'], lp['bn_beta'], lp['bn_mean'], lp['bn_var'],
          next_w, next_b)
        proj = out
        h_last = rst

    return out[:, :params['n_classes']]   # slice padded logits outside the kernel


# --------------------------------------------------------------------------
if __name__ == "__main__":
    N_NODES = 32
    NODE_FEATS = 8
    EDGE_FEATS = 8
    EDGE_EMB = 8
    N_HIDDEN = 16
    N_HEADS = 2
    N_LAYERS = 2
    N_CLASSES = 16

    key = jax.random.PRNGKey(0)
    k_feat, k_edge, k_adj, k_param = jax.random.split(key, 4)

    node_feat = jax.random.normal(k_feat, (N_NODES, NODE_FEATS), dtype=jnp.float32)
    # dense edge features for every (dst, src) pair; only pairs with
    # adj[src, dst] == 1 participate (masked via the additive softmax bias).
    edge_feat = jax.random.normal(k_edge, (N_NODES, N_NODES, EDGE_FEATS),
                                  dtype=jnp.float32)
    adj = (jax.random.uniform(k_adj, (N_NODES, N_NODES)) < 0.3).astype(jnp.float32)
    adj = jnp.maximum(adj, jnp.eye(N_NODES, dtype=jnp.float32))  # self-loops: >=1 in-edge per dst

    params = make_params(k_param, NODE_FEATS, EDGE_FEATS, EDGE_EMB,
                         N_HIDDEN, N_HEADS, N_LAYERS, N_CLASSES)

    out = gat_forward(params, node_feat, edge_feat, adj, dst_block=16)
    out = jax.block_until_ready(out)
    assert out.shape == (N_NODES, N_CLASSES)
    assert bool(jnp.all(jnp.isfinite(out)))
    print("KERNEL_OK")
</pallas_src>

<mosaic_0001>
module attributes {stable_mosaic.version = 11 : i64} {
  func.func @_encode_proj_kernel(%arg0: memref<32x8xf32, #tpu.memory_space<vmem>>, %arg1: memref<8x16xbf16, #tpu.memory_space<vmem>>, %arg2: memref<1x16xf32, #tpu.memory_space<vmem>>, %arg3: memref<16x128xbf16, #tpu.memory_space<vmem>>, %arg4: memref<1x128xf32, #tpu.memory_space<vmem>>, %arg5: memref<32x128xf32, #tpu.memory_space<vmem>>) attributes {dimension_semantics = [], scalar_prefetch = 0 : i64, scratch_operands = 0 : i64, tpu.core_type = #tpu.core_type<tc>} {
    %c0 = arith.constant 0 : index
    %c0_0 = arith.constant 0 : index
    %0 = vector.load %arg0[%c0, %c0_0] : memref<32x8xf32, #tpu.memory_space<vmem>>, vector<32x8xf32>
    %c0_1 = arith.constant 0 : index
    %c0_2 = arith.constant 0 : index
    %1 = vector.load %arg1[%c0_1, %c0_2] : memref<8x16xbf16, #tpu.memory_space<vmem>>, vector<8x16xbf16>
    %2 = arith.truncf %0 : vector<32x8xf32> to vector<32x8xbf16>
    %cst = arith.constant dense<0.000000e+00> : vector<32x16xf32>
    %3 = tpu.matmul %2, %1, %cst {dimension_numbers = #tpu.dot_dimension_numbers<[1], [0], [0], [1], [0, 0, 1, 1], [], []>} : vector<32x8xbf16>, vector<8x16xbf16>, vector<32x16xf32> -> vector<32x16xf32>
    %c0_3 = arith.constant 0 : index
    %c0_4 = arith.constant 0 : index
    %4 = vector.load %arg2[%c0_3, %c0_4] : memref<1x16xf32, #tpu.memory_space<vmem>>, vector<1x16xf32>
    %5 = vector.broadcast %4 : vector<1x16xf32> to vector<32x16xf32>
    %6 = arith.addf %3, %5 : vector<32x16xf32>
    %cst_5 = arith.constant 0.000000e+00 : f32
    %7 = vector.broadcast %cst_5 : f32 to vector<32x16xf32>
    %8 = arith.maximumf %6, %7 : vector<32x16xf32>
    %c0_6 = arith.constant 0 : index
    %c0_7 = arith.constant 0 : index
    %9 = vector.load %arg3[%c0_6, %c0_7] : memref<16x128xbf16, #tpu.memory_space<vmem>>, vector<16x128xbf16>
    %10 = arith.truncf %8 : vector<32x16xf32> to vector<32x16xbf16>
    %cst_8 = arith.constant dense<0.000000e+00> : vector<32x128xf32>
    %11 = tpu.matmul %10, %9, %cst_8 {dimension_numbers = #tpu.dot_dimension_numbers<[1], [0], [0], [1], [0, 0, 1, 1], [], []>} : vector<32x16xbf16>, vector<16x128xbf16>, vector<32x128xf32> -> vector<32x128xf32>
    %c0_9 = arith.constant 0 : index
    %c0_10 = arith.constant 0 : index
    %12 = vector.load %arg4[%c0_9, %c0_10] : memref<1x128xf32, #tpu.memory_space<vmem>>, vector<1x128xf32>
    %13 = vector.broadcast %12 : vector<1x128xf32> to vector<32x128xf32>
    %14 = arith.addf %11, %13 : vector<32x128xf32>
    %c0_11 = arith.constant 0 : index
    %c0_12 = arith.constant 0 : index
    %15 = vector.load %arg5[%c0_11, %c0_12] : memref<32x128xf32, #tpu.memory_space<vmem>>, vector<32x128xf32>
    tpu.vector_store %arg5[%c0_11, %c0_12], %14 {strides = array<i32>} : memref<32x128xf32, #tpu.memory_space<vmem>>, vector<32x128xf32>,
    return
  }
}

</mosaic_0001>

<bundles_post_ra>
// kernel: tpu_custom_call.1
= control target key start
LH: loop header
LB: loop body
LE: loop exit
PB: predicated region body
PF: predicated region fallthrough
CT: control target
= control target key end

     0   :  { %vm43_vm0 = vcmask 1043456   ;;  %vm36_vm1 = vcmask 64512   ;;  %s316_s0 = inlined_call_operand.vmem [shape: f32[32,8], index: 0, kind: input, shape index: {}]   ;;  %s317_s1 = inlined_call_operand.vmem [shape: bf16[8,16], index: 1, kind: input, shape index: {}]   ;;  %s318_s2 = inlined_call_operand.vmem [shape: f32[1,16], index: 2, kind: input, shape index: {}]   ;;  %s319_s3 = inlined_call_operand.vmem [shape: bf16[16,128], index: 3, kind: input, shape index: {}]   ;;  %s320_s4 = inlined_call_operand.vmem [shape: f32[1,128], index: 4, kind: input, shape index: {}]   ;;  %s321_s5 = inlined_call_operand.hbm [shape: f32[32,128], index: 5, kind: output, shape index: {}]  }
   0x1   :  { %v26_v0 = vld [vmem:[%s317_s1] sm:$0xf]  ;;  %v23_v2 = vld [vmem:[%s316_s0 + $0x8] sm:$0xff]  ;;  %v24_v5 = vld [vmem:[%s316_s0 + $0x10] sm:$0xff] }
   0x2   :  { %v22_v1 = vld [vmem:[%s316_s0] sm:$0xff]  ;;  %218 = vmatprep.subr.msk.bf16.mxu0 %vm43_vm0, %v26_v0  ;;  %v45_v3 = vsel %vm43_vm0, %v26_v0, 0  ;;  %v25_v6 = vld [vmem:[%s316_s0 + $0x18] sm:$0xff] }
   0x3   :  { %v27_v4 = vpack.c.bf16 %v23_v2, %v22_v1  ;;  %207 = vmatpush3.bf16.msra.mxu0 %v45_v3  ;;  %v28_v7 = vpack.c.bf16 %v25_v6, %v24_v5 }
   0x4   :  { %10 = vsyncpa [#allocation3], 0  ;;  %v222_v8 = vld [vmem:[%s319_s3] sm:$0xff]   ;;  %vm117_vm2 = vcmask 130048  }
   0x5   :  { %208 = vmatprep.mubr.msk.bf16.mxu0 %vm36_vm1, %v27_v4  ;;  %212 = vmatprep.subr.bf16.mxu1 %v222_v8  ;;  %v193_v9 = vld [vmem:[%s318_s2] ss:$0 sm:$0xff]  ;;  %s247_s2 = smov [#allocation2]  }
   0x6   :  { %209 = vmatmul.mubr.msk.bf16.vlgmr.msra.gmra.mrb[0].mxu0 %vm36_vm1, %v28_v7  ;;  %213 = vmatpush3.bf16.msra.mxu1 %v222_v8  ;;  %v196_v24 = vld [vmem:[%s320_s4] ss:$0 sm:$0xff]  ;;  %s182_s6 = sshll.u32 %s247_s2, 4  ;;  %s183_s6 = int_to_ptr.vmem [resolvable:$true] %s182_s6 }
   0x7   :  { %s223_s7 = scalar_lea.vmem %s183_s6, 512  ;;  %p228_p1 = scmp.lt.s32.totalorder %s183_s6, %s183_s6 }
   0x8   :  { %p224_p0 = scmp.ne.s32.totalorder %s183_s6, %s223_s7  ;;  %p229_p2 = scmp.lt.s32.totalorder %s223_s7, %s223_s7 }
   0xa   :  { %p230_p3 = por %p229_p2, %p228_p1 }
   0xc   :  { %p231_p4 = pnand %p230_p3, %p224_p0 }
  0xd9   :  { %v210_v10 = vpop.f32.mrb[0].mxu0 }
  0xda   :  { %v90_v11 = vadd.f32 %v210_v10, %v193_v9  ;;  %v81_v12 = vpop.f32.mrb[1].mxu0 }
  0xdb   :  { %v82_v13 = vadd.f32 %v193_v9, %v81_v12  ;;  %v211_v14 = vpop.f32.mrb[2].mxu0 }
  0xdc   :  { %v93_v15 = vadd.f32 %v211_v14, %v193_v9  ;;  %v84_v16 = vpop.f32.mrb[3].mxu0  ;;  %v98_v18 = vmax.f32 %v90_v11, 0.0 }
  0xdd   :  { %v85_v17 = vadd.f32 %v193_v9, %v84_v16  ;;  %v96_v20 = vmax.f32 %v82_v13, 0.0 }
  0xde   :  { %v99_v19 = vmax.f32 %v93_v15, 0.0 }
  0xdf   :  { %v97_v21 = vmax.f32 %v85_v17, 0.0 }
  0xe0   :  { %v103_v22 = vpack.c.bf16 %v99_v19, %v98_v18 }
  0xe1   :  { %v102_v23 = vpack.c.bf16 %v97_v21, %v96_v20 }
  0xe3   :  { %214 = vmatprep.mubr.msk.bf16.mxu1 %vm117_vm2, %v102_v23 }
  0xe4   :  { %215 = vmatmul.mubr.msk.bf16.vlgmr.msra.gmra.mrb[0].mxu1 %vm117_vm2, %v103_v22 }
 0x1b7   :  { %v216_v25 = vpop.f32.mrb[0].mxu1 }
 0x1b8   :  { %v167_v26 = vadd.f32 %v216_v25, %v196_v24  ;;  %v158_v27 = vpop.f32.mrb[1].mxu1 }
 0x1b9   :  { %v159_v28 = vadd.f32 %v196_v24, %v158_v27  ;;  %v217_v29 = vpop.f32.mrb[2].mxu1 }
 0x1ba   :  { %175 = vst [vmem:[#allocation2 + $0x10] sm:$0xff] %v167_v26  ;;  %v170_v30 = vadd.f32 %v217_v29, %v196_v24  ;;  %v161_v31 = vpop.f32.mrb[3].mxu1 }
 0x1bb   :  { %173 = vst [vmem:[#allocation2] sm:$0xff] %v159_v28  ;;  %v162_v32 = vadd.f32 %v196_v24, %v161_v31 }
 0x1bc   :  { %176 = vst [vmem:[#allocation2 + $0x18] sm:$0xff] %v170_v30 }
 0x1bd   :  { %174 = vst [vmem:[#allocation2 + $0x8] sm:$0xff] %v162_v32 }
 0x1be   :  { %234 = shalt.err (!%p231_p4)
}
 0x1bf   :  { %s235_s9 = scalar_lea.hbm %s321_s5, 512 }
 0x1c0   :  { %p236_p5 = scmp.ne.s32.totalorder %s321_s5, %s235_s9  ;;  %p239_p6 = scmp.lt.u32.totalorder %s235_s9, %s321_s5 }
 0x1c2   :  { %p241_p7 = pnand %p239_p6, %p236_p5 }
 0x1c4   :  { %244 = shalt.err (!%p241_p7)
}
 0x1c5   :  { %s248_s14 = smov 128   ;;  %s249_s15 = smov 8  }
 0x1c6   :  { %188 = dma.vmem_to_hbm [thread:$0]  %s183_s6, 512, %s321_s5, [#allocation3], %s248_s14, %s248_s14, %s249_s15  }
 0x1c7   :  { %245 = dma.done.wait [#allocation3], 512  }
 0x1c8   :  { %246 = vsyncadd [#allocation3], 4294966784 }
 0x1c9   :  { %192 = vsyncpa [#allocation3], 1 }

</bundles_post_ra>
